<compile_context>
chip_gen: v5e
topology: v5e:2x2
jax: 0.10.0
libtpu: 0.0.40
codegen_flags: <defaults>
</compile_context>

<pallas_src>
import functools
import math

import jax
import jax.numpy as jnp
from jax.experimental import pallas as pl
from jax.experimental.pallas import tpu as pltpu

_LANE = 128
_SUBLANE = 8
_HEADROOM_BYTES = 2 * 2**20          # compiler-internal scratch headroom
_SINGLE_BUFFER_THRESH = 2 * 2**20    # single-buffer weights above this size


def _round_up(v: int, m: int) -> int:
    return (v + m - 1) // m * m


def _cdiv(a: int, b: int) -> int:
    return (a + b - 1) // b


def _probe_pipeline_mode() -> bool:
    """Check that pl.BlockSpec accepts pipeline_mode=pl.Buffered(k)."""
    if not hasattr(pl, "Buffered"):
        return False
    try:
        pl.BlockSpec((8, 128), lambda i: (i, 0), pipeline_mode=pl.Buffered(1))
        return True
    except Exception:
        return False


_PIPELINE_MODE_OK = _probe_pipeline_mode()


def _vmem_budget_bytes() -> int:
    """Per-core VMEM budget with headroom, generation-aware."""
    try:
        cap = int(pltpu.get_tpu_info().vmem_capacity_bytes)
    except Exception:
        cap = 0
    if cap <= 0:
        cap = 64 * 2**20  # conservative: v7x per-TensorCore VMEM
    # Leave 25% headroom; never request more than 100 MiB even on 128 MiB gens.
    return min(cap * 3 // 4, 100 * 2**20)


def _mlp_kernel(*refs, num_layers: int, relu_last: bool):
    """refs = (x_ref, w0, b0, w1, b1, ..., o_ref) for one batch tile.

    Matmuls accumulate in f32 on the MXU; bias add + ReLU run in f32 on the
    VPU; the ReLU'd activation is cast back to the compute dtype immediately
    so the live intermediate stays narrow (bf16) between layers.
    """
    x_ref = refs[0]
    o_ref = refs[1 + 2 * num_layers]
    h = x_ref[...]
    for i in range(num_layers):
        w = refs[1 + 2 * i][...]
        b = refs[2 + 2 * i][...]
        acc = jnp.dot(h, w, preferred_element_type=jnp.float32)
        acc = acc + b.astype(jnp.float32)
        last = i == num_layers - 1
        if (not last) or relu_last:
            acc = jnp.maximum(acc, 0.0)
        if not last:
            h = acc.astype(w.dtype)   # narrow intermediate right after ReLU
        else:
            h = acc
    o_ref[...] = h.astype(o_ref.dtype)


def prepare_mlp_params(params, compute_dtype=jnp.bfloat16):
    """Zero-pad feature dims to multiples of 128 (exact: pads are zero) and
    cast weights to the matmul compute dtype.  The final layer's OUTPUT dim
    is left unpadded so the kernel output is exactly [N, out_channels].
    Biases are kept in f32 for the f32 epilogue."""
    padded = []
    n_layers = len(params)
    for idx, (w, b) in enumerate(params):
        c_in, c_out = w.shape
        c_in_p = _round_up(c_in, _LANE)
        c_out_p = c_out if idx == n_layers - 1 else _round_up(c_out, _LANE)
        w_p = jnp.zeros((c_in_p, c_out_p), compute_dtype)
        w_p = w_p.at[:c_in, :c_out].set(w.astype(compute_dtype))
        b_p = jnp.zeros((1, c_out_p), jnp.float32)
        b_p = b_p.at[0, :c_out].set(b.astype(jnp.float32))
        padded.append((w_p, b_p))
    return padded


def _plan_call(layers, c_in_p, out_cols, tile_n, compute_dtype, out_dtype, budget):
    """Pick tile size / buffering / vmem limit for one pallas_call."""
    itemsize = jnp.dtype(compute_dtype).itemsize
    out_itemsize = jnp.dtype(out_dtype).itemsize
    weight_bytes = sum(int(w.size) * w.dtype.itemsize + int(b.size) * b.dtype.itemsize
                       for w, b in layers)
    max_width = max(w.shape[1] for w, _ in layers)

    weight_single_buffer = _PIPELINE_MODE_OK and weight_bytes > _SINGLE_BUFFER_THRESH
    resident = weight_bytes if weight_single_buffer else 2 * weight_bytes

    def total(t):
        # double-buffered x/out tiles + f32 intermediate headroom
        tiles = 2 * t * (c_in_p * itemsize + out_cols * out_itemsize)
        tiles += 2 * t * max_width * 4
        return resident + tiles + _HEADROOM_BYTES

    while total(tile_n) > budget and tile_n > _SUBLANE:
        tile_n = max(_SUBLANE, _round_up(tile_n // 2, _SUBLANE))

    fits = total(tile_n) <= budget
    vmem_limit = int(min(budget, max(total(tile_n), 4 * 2**20)))
    return tile_n, weight_single_buffer, vmem_limit, fits, weight_bytes


def _run_single_call(x_p, layers, *, tile_n, out_dtype, relu_last,
                     weight_single_buffer, vmem_limit):
    """One pallas_call evaluating `layers` over all batch tiles of x_p."""
    n, c_in_p = x_p.shape
    num_layers = len(layers)
    out_cols = layers[-1][0].shape[1]

    def _spec(shape, index_map, buffers=None):
        if buffers is not None and _PIPELINE_MODE_OK:
            return pl.BlockSpec(shape, index_map, pipeline_mode=pl.Buffered(buffers))
        return pl.BlockSpec(shape, index_map)

    in_specs = [_spec((tile_n, c_in_p), lambda i: (i, 0))]
    flat = []
    wbuf = 1 if weight_single_buffer else None
    for w_p, b_p in layers:
        flat += [w_p, b_p]
        # Constant index_map -> weights/biases stay VMEM-resident for all tiles.
        in_specs.append(_spec(w_p.shape, lambda i: (0, 0), buffers=wbuf))
        in_specs.append(_spec(b_p.shape, lambda i: (0, 0), buffers=wbuf))
    out_spec = pl.BlockSpec((tile_n, out_cols), lambda i: (i, 0))

    weight_bytes = sum(int(w.size) * w.dtype.itemsize + int(b.size) * b.dtype.itemsize
                       for w, b in layers)
    act_bytes = n * (c_in_p * x_p.dtype.itemsize
                     + out_cols * jnp.dtype(out_dtype).itemsize)
    flops = 2 * n * sum(w.shape[0] * w.shape[1] for w, _ in layers)

    return pl.pallas_call(
        functools.partial(_mlp_kernel, num_layers=num_layers, relu_last=relu_last),
        out_shape=jax.ShapeDtypeStruct((n, out_cols), out_dtype),
        grid=(_cdiv(n, tile_n),),
        in_specs=in_specs,
        out_specs=out_spec,
        compiler_params=pltpu.CompilerParams(
            dimension_semantics=("parallel",),   # batch tiles are independent
            vmem_limit_bytes=vmem_limit,
        ),
        cost_estimate=pl.CostEstimate(
            flops=flops,
            transcendentals=0,
            bytes_accessed=weight_bytes + act_bytes,
        ),
    )(x_p, *flat)


def mlp_forward(x, padded_params, *, tile_n=512, out_dtype=None):
    """Fused MLP forward.  x: [N, C_in] (unpadded); padded_params from
    prepare_mlp_params.  Returns [N, out_channels]."""
    n, c_in = x.shape
    num_layers = len(padded_params)
    compute_dtype = padded_params[0][0].dtype
    c_in_p = padded_params[0][0].shape[0]
    out_cols = padded_params[-1][0].shape[1]
    out_dtype = x.dtype if out_dtype is None else out_dtype

    # Input: cast and pad features only if needed (no batch padding; the grid
    # is ragged and OOB tail rows never produce visible output rows).
    if c_in_p == c_in:
        x_p = x.astype(compute_dtype)
    else:
        x_p = jnp.zeros((n, c_in_p), compute_dtype)
        x_p = x_p.at[:, :c_in].set(x.astype(compute_dtype))

    # Batch tile selection: large tiles amortize the ~0.35us/step overhead.
    tile_n = max(_SUBLANE, min(tile_n, _round_up(n, _SUBLANE)))
    tile_n = _round_up(tile_n, _SUBLANE)
    if n >= 2 * _SUBLANE and _cdiv(n, tile_n) < 2:
        # v7x megacore: give both TensorCores at least one batch tile.
        tile_n = _round_up(_cdiv(n, 2), _SUBLANE)

    budget = _vmem_budget_bytes()

    # --- fused fast path: all weights VMEM-resident ---
    ftile, wsb, vlim, fits, _ = _plan_call(
        padded_params, c_in_p, out_cols, tile_n, compute_dtype, out_dtype, budget)
    if fits:
        return _run_single_call(
            x_p, padded_params, tile_n=ftile, out_dtype=out_dtype,
            relu_last=False, weight_single_buffer=wsb, vmem_limit=vlim)

    # --- fallback: weights too big for resident fusion -> per-layer calls ---
    # TODO(synk): if a single layer's weights still exceed VMEM, stream the
    #             weight over an output-feature/K axis (emit_pipeline) here.
    h = x_p
    for idx, (w_p, b_p) in enumerate(padded_params):
        last = idx == num_layers - 1
        layer = [(w_p, b_p)]
        l_out_dtype = out_dtype if last else compute_dtype
        ltile, lwsb, lvlim, _, _ = _plan_call(
            layer, h.shape[1], w_p.shape[1], tile_n, compute_dtype,
            l_out_dtype, budget)
        h = _run_single_call(
            h, layer, tile_n=ltile, out_dtype=l_out_dtype,
            relu_last=not last, weight_single_buffer=lwsb, vmem_limit=lvlim)
    return h


def init_mlp_params(key, in_channels, out_channels, hidden_channels, num_layers):
    """Deterministic init matching torch.nn.Linear's default
    U(-1/sqrt(fan_in), 1/sqrt(fan_in)).  Weights stored as [C_in, C_out]."""
    if num_layers == 1:
        hidden_channels = in_channels
    assert num_layers > 0
    dims = []
    for i in range(num_layers - 1):
        c_in = in_channels if i == 0 else hidden_channels
        dims.append((c_in, hidden_channels))
    dims.append((hidden_channels, out_channels))

    params = []
    for (c_in, c_out) in dims:
        key, kw, kb = jax.random.split(key, 3)
        bound = 1.0 / math.sqrt(c_in)
        w = jax.random.uniform(kw, (c_in, c_out), jnp.float32, -bound, bound)
        b = jax.random.uniform(kb, (c_out,), jnp.float32, -bound, bound)
        params.append((w, b))
    return params


if __name__ == "__main__":
    # Small shapes consistent with the module: x is [batch, in_channels].
    batch = 8
    in_channels = 16
    hidden_channels = 32
    out_channels = 8
    num_layers = 3

    key = jax.random.PRNGKey(0)
    key_x, key_p = jax.random.split(key)
    x = jax.random.normal(key_x, (batch, in_channels), jnp.float32)
    params = init_mlp_params(
        key_p, in_channels, out_channels, hidden_channels, num_layers
    )

    # --- f32 compute path: must match the pure-JAX (PyTorch-equivalent)
    #     reference tightly.
    padded_f32 = prepare_mlp_params(params, compute_dtype=jnp.float32)
    out = mlp_forward(x, padded_f32)
    out = jax.block_until_ready(out)

    ref = x
    for i, (w, b) in enumerate(params):
        ref = ref @ w + b
        if i != len(params) - 1:
            ref = jnp.maximum(ref, 0.0)
    assert out.shape == (batch, out_channels)
    assert jnp.allclose(out, ref, atol=1e-5, rtol=1e-5)

    # --- bf16 matmul path (f32 accumulation + f32 bias/ReLU epilogue):
    #     compare against a pure-JAX reference with the same compute dtype.
    padded_bf16 = prepare_mlp_params(params, compute_dtype=jnp.bfloat16)
    out_bf16 = mlp_forward(x, padded_bf16)
    out_bf16 = jax.block_until_ready(out_bf16)

    ref16 = x
    for i, (w, b) in enumerate(params):
        ref16 = jnp.dot(ref16.astype(jnp.bfloat16), w.astype(jnp.bfloat16),
                        preferred_element_type=jnp.float32) + b
        if i != len(params) - 1:
            ref16 = jnp.maximum(ref16, 0.0)
    assert out_bf16.shape == (batch, out_channels)
    assert jnp.allclose(out_bf16, ref16, atol=5e-2, rtol=5e-2)

    print("KERNEL_OK")
</pallas_src>

<mosaic_0001>
module attributes {stable_mosaic.version = 11 : i64} {
  func.func @_mlp_kernel(%arg0: i32, %arg1: memref<8x128xf32, #tpu.memory_space<vmem>>, %arg2: memref<128x128xf32, #tpu.memory_space<vmem>>, %arg3: memref<1x128xf32, #tpu.memory_space<vmem>>, %arg4: memref<128x128xf32, #tpu.memory_space<vmem>>, %arg5: memref<1x128xf32, #tpu.memory_space<vmem>>, %arg6: memref<128x8xf32, #tpu.memory_space<vmem>>, %arg7: memref<1x8xf32, #tpu.memory_space<vmem>>, %arg8: memref<8x8xf32, #tpu.memory_space<vmem>>) attributes {dimension_semantics = [#tpu.dimension_semantics<parallel>], iteration_bounds = array<i64: 1>, scalar_prefetch = 0 : i64, scratch_operands = 0 : i64, tpu.core_type = #tpu.core_type<tc>, window_params = [{transform_indices = @transform_0, window_bounds = array<i64: 8, 128>}, {pipeline_mode = #tpu.pipeline_mode<synchronous>, transform_indices = @transform_1, window_bounds = array<i64: 128, 128>}, {pipeline_mode = #tpu.pipeline_mode<synchronous>, transform_indices = @transform_2, window_bounds = array<i64: 1, 128>}, {pipeline_mode = #tpu.pipeline_mode<synchronous>, transform_indices = @transform_3, window_bounds = array<i64: 128, 128>}, {pipeline_mode = #tpu.pipeline_mode<synchronous>, transform_indices = @transform_4, window_bounds = array<i64: 1, 128>}, {pipeline_mode = #tpu.pipeline_mode<synchronous>, transform_indices = @transform_5, window_bounds = array<i64: 128, 8>}, {pipeline_mode = #tpu.pipeline_mode<synchronous>, transform_indices = @transform_6, window_bounds = array<i64: 1, 8>}, {transform_indices = @transform_7, window_bounds = array<i64: 8, 8>}]} {
    %c0 = arith.constant 0 : index
    %c0_0 = arith.constant 0 : index
    %0 = vector.load %arg1[%c0, %c0_0] : memref<8x128xf32, #tpu.memory_space<vmem>>, vector<8x128xf32>
    %c0_1 = arith.constant 0 : index
    %c0_2 = arith.constant 0 : index
    %1 = vector.load %arg2[%c0_1, %c0_2] : memref<128x128xf32, #tpu.memory_space<vmem>>, vector<128x128xf32>
    %c0_3 = arith.constant 0 : index
    %c0_4 = arith.constant 0 : index
    %2 = vector.load %arg3[%c0_3, %c0_4] : memref<1x128xf32, #tpu.memory_space<vmem>>, vector<1x128xf32>
    %cst = arith.constant dense<0.000000e+00> : vector<8x128xf32>
    %3 = tpu.matmul %0, %1, %cst {dimension_numbers = #tpu.dot_dimension_numbers<[1], [0], [0], [1], [0, 0, 1, 1], [], []>} : vector<8x128xf32>, vector<128x128xf32>, vector<8x128xf32> -> vector<8x128xf32>
    %4 = vector.broadcast %2 : vector<1x128xf32> to vector<8x128xf32>
    %5 = arith.addf %3, %4 : vector<8x128xf32>
    %cst_5 = arith.constant 0.000000e+00 : f32
    %6 = vector.broadcast %cst_5 : f32 to vector<8x128xf32>
    %7 = arith.maximumf %5, %6 : vector<8x128xf32>
    %c0_6 = arith.constant 0 : index
    %c0_7 = arith.constant 0 : index
    %8 = vector.load %arg4[%c0_6, %c0_7] : memref<128x128xf32, #tpu.memory_space<vmem>>, vector<128x128xf32>
    %c0_8 = arith.constant 0 : index
    %c0_9 = arith.constant 0 : index
    %9 = vector.load %arg5[%c0_8, %c0_9] : memref<1x128xf32, #tpu.memory_space<vmem>>, vector<1x128xf32>
    %cst_10 = arith.constant dense<0.000000e+00> : vector<8x128xf32>
    %10 = tpu.matmul %7, %8, %cst_10 {dimension_numbers = #tpu.dot_dimension_numbers<[1], [0], [0], [1], [0, 0, 1, 1], [], []>} : vector<8x128xf32>, vector<128x128xf32>, vector<8x128xf32> -> vector<8x128xf32>
    %11 = vector.broadcast %9 : vector<1x128xf32> to vector<8x128xf32>
    %12 = arith.addf %10, %11 : vector<8x128xf32>
    %cst_11 = arith.constant 0.000000e+00 : f32
    %13 = vector.broadcast %cst_11 : f32 to vector<8x128xf32>
    %14 = arith.maximumf %12, %13 : vector<8x128xf32>
    %c0_12 = arith.constant 0 : index
    %c0_13 = arith.constant 0 : index
    %15 = vector.load %arg6[%c0_12, %c0_13] : memref<128x8xf32, #tpu.memory_space<vmem>>, vector<128x8xf32>
    %c0_14 = arith.constant 0 : index
    %c0_15 = arith.constant 0 : index
    %16 = vector.load %arg7[%c0_14, %c0_15] : memref<1x8xf32, #tpu.memory_space<vmem>>, vector<1x8xf32>
    %cst_16 = arith.constant dense<0.000000e+00> : vector<8x8xf32>
    %17 = tpu.matmul %14, %15, %cst_16 {dimension_numbers = #tpu.dot_dimension_numbers<[1], [0], [0], [1], [0, 0, 1, 1], [], []>} : vector<8x128xf32>, vector<128x8xf32>, vector<8x8xf32> -> vector<8x8xf32>
    %18 = vector.broadcast %16 : vector<1x8xf32> to vector<8x8xf32>
    %19 = arith.addf %17, %18 : vector<8x8xf32>
    %c0_17 = arith.constant 0 : index
    %c0_18 = arith.constant 0 : index
    %20 = vector.load %arg8[%c0_17, %c0_18] : memref<8x8xf32, #tpu.memory_space<vmem>>, vector<8x8xf32>
    tpu.vector_store %arg8[%c0_17, %c0_18], %19 {strides = array<i32>} : memref<8x8xf32, #tpu.memory_space<vmem>>, vector<8x8xf32>,
    return
  }
  func.func @transform_0(%arg0: i32) -> (i32, i32) {
    %c0_i32 = arith.constant 0 : i32
    %c0_i32_0 = arith.constant 0 : i32
    return %arg0, %c0_i32 : i32, i32
  }
  func.func @transform_1(%arg0: i32) -> (i32, i32) {
    %c0_i32 = arith.constant 0 : i32
    %c0_i32_0 = arith.constant 0 : i32
    %c0_i32_1 = arith.constant 0 : i32
    return %c0_i32, %c0_i32_0 : i32, i32
  }
  func.func @transform_2(%arg0: i32) -> (i32, i32) {
    %c0_i32 = arith.constant 0 : i32
    %c0_i32_0 = arith.constant 0 : i32
    %c0_i32_1 = arith.constant 0 : i32
    return %c0_i32, %c0_i32_0 : i32, i32
  }
  func.func @transform_3(%arg0: i32) -> (i32, i32) {
    %c0_i32 = arith.constant 0 : i32
    %c0_i32_0 = arith.constant 0 : i32
    %c0_i32_1 = arith.constant 0 : i32
    return %c0_i32, %c0_i32_0 : i32, i32
  }
  func.func @transform_4(%arg0: i32) -> (i32, i32) {
    %c0_i32 = arith.constant 0 : i32
    %c0_i32_0 = arith.constant 0 : i32
    %c0_i32_1 = arith.constant 0 : i32
    return %c0_i32, %c0_i32_0 : i32, i32
  }
  func.func @transform_5(%arg0: i32) -> (i32, i32) {
    %c0_i32 = arith.constant 0 : i32
    %c0_i32_0 = arith.constant 0 : i32
    %c0_i32_1 = arith.constant 0 : i32
    return %c0_i32, %c0_i32_0 : i32, i32
  }
  func.func @transform_6(%arg0: i32) -> (i32, i32) {
    %c0_i32 = arith.constant 0 : i32
    %c0_i32_0 = arith.constant 0 : i32
    %c0_i32_1 = arith.constant 0 : i32
    return %c0_i32, %c0_i32_0 : i32, i32
  }
  func.func @transform_7(%arg0: i32) -> (i32, i32) {
    %c0_i32 = arith.constant 0 : i32
    %c0_i32_0 = arith.constant 0 : i32
    return %arg0, %c0_i32 : i32, i32
  }
}

</mosaic_0001>

<bundles_post_ra>
// kernel: tpu_custom_call.1
= control target key start
LH: loop header
LB: loop body
LE: loop exit
PB: predicated region body
PF: predicated region fallthrough
CT: control target
= control target key end

     0   :  { %12 = vsyncpa [#allocation3], 0  ;;  %s402_s0 = inlined_call_operand.vmem [shape: f32[8,128], index: 0, kind: input, shape index: {}]   ;;  %s403_s1 = inlined_call_operand.vmem [shape: f32[128,128], index: 1, kind: input, shape index: {}]   ;;  %s404_s2 = inlined_call_operand.vmem [shape: f32[1,128], index: 2, kind: input, shape index: {}]   ;;  %s405_s3 = inlined_call_operand.hbm [shape: f32[128,128], index: 3, kind: input, shape index: {}]   ;;  %s406_s4 = inlined_call_operand.vmem [shape: f32[1,128], index: 4, kind: input, shape index: {}]   ;;  %s407_s5 = inlined_call_operand.vmem [shape: f32[128,8], index: 5, kind: input, shape index: {}]   ;;  %s408_s6 = inlined_call_operand.vmem [shape: f32[1,8], index: 6, kind: input, shape index: {}]   ;;  %s409_s7 = inlined_call_operand.hbm [shape: f32[8,8], index: 7, kind: output, shape index: {}]  }
   0x1   :  { %13 = vsyncpa [#allocation4], 0  ;;  %s24_s26 = sshll.u32 %s405_s3, 4  ;;  %s244_s27 = smov [#allocation2]   ;;  %s25_s26 = int_to_ptr.hbm [resolvable:$true] %s24_s26 }
   0x2   :  { %s26_s28 = sshll.u32 %s244_s27, 4  ;;  %s245_s29 = smov 128   ;;  %s27_s28 = int_to_ptr.vmem [resolvable:$true] %s26_s28 }
   0x3   :  { %s246_s30 = smov 8  }
   0x4   :  { %32 = dma.hbm_to_vmem [thread:$0]  %s25_s26, 2048, %s27_s28, [#allocation3], %s245_s29, %s245_s29, %s246_s30  }
   0x5   :  { %240 = dma.done.wait [#allocation3], 2048  }
   0x6   :  { %241 = vsyncadd [#allocation3], 4294965248  ;;  %v59_v0 = vld [vmem:[%s403_s1 + $0x78] sm:$0xff]  ;;  %v58_v1 = vld [vmem:[%s403_s1 + $0x70] sm:$0xff]  ;;  %s247_s26 = smov [#allocation5]   ;;  %s175_s30 = sshll.u32 %s409_s7, 4  ;;  %s176_s30 = int_to_ptr.hbm [resolvable:$true] %s175_s30 }
   0x7   :  { %64 = vmatpush.msra.mxu0 %v59_v0  ;;  %v57_v2 = vld [vmem:[%s403_s1 + $0x68] sm:$0xff]  ;;  %v56_v3 = vld [vmem:[%s403_s1 + $0x60] sm:$0xff]  ;;  %v100_v4 = vld [vmem:[#allocation2 + $0x78] sm:$0xff]  ;;  %s173_s27 = sshll.u32 %s247_s26, 4  ;;  %vm166_vm0 = vcmask 64512   ;;  %s174_s27 = int_to_ptr.vmem [resolvable:$true] %s173_s27 }
   0x8   :  { %v55_v5 = vld [vmem:[%s403_s1 + $0x58] sm:$0xff]  ;;  %105 = vmatpush.msra.mxu1 %v100_v4  ;;  %v99_v6 = vld [vmem:[#allocation2 + $0x70] sm:$0xff]  ;;  %v98_v7 = vld [vmem:[#allocation2 + $0x68] sm:$0xff] }
   0x9   :  { %65 = vmatpush.msra.mxu0 %v58_v1  ;;  %v54_v8 = vld [vmem:[%s403_s1 + $0x50] sm:$0xff]  ;;  %v97_v9 = vld [vmem:[#allocation2 + $0x60] sm:$0xff]  ;;  %v53_v10 = vld [vmem:[%s403_s1 + $0x48] sm:$0xff] }
   0xa   :  { %106 = vmatpush.msra.mxu1 %v99_v6  ;;  %v96_v11 = vld [vmem:[#allocation2 + $0x58] sm:$0xff]  ;;  %v52_v12 = vld [vmem:[%s403_s1 + $0x40] sm:$0xff]  ;;  %v95_v13 = vld [vmem:[#allocation2 + $0x50] sm:$0xff] }
   0xb   :  { %66 = vmatpush.msra.mxu0 %v57_v2  ;;  %v51_v14 = vld [vmem:[%s403_s1 + $0x38] sm:$0xff]  ;;  %v94_v15 = vld [vmem:[#allocation2 + $0x48] sm:$0xff]  ;;  %v50_v16 = vld [vmem:[%s403_s1 + $0x30] sm:$0xff] }
   0xc   :  { %107 = vmatpush.msra.mxu1 %v98_v7  ;;  %v93_v17 = vld [vmem:[#allocation2 + $0x40] sm:$0xff]  ;;  %v49_v18 = vld [vmem:[%s403_s1 + $0x28] sm:$0xff]  ;;  %v92_v19 = vld [vmem:[#allocation2 + $0x38] sm:$0xff] }
   0xd   :  { %67 = vmatpush.msra.mxu0 %v56_v3  ;;  %v48_v20 = vld [vmem:[%s403_s1 + $0x20] sm:$0xff]  ;;  %v91_v21 = vld [vmem:[#allocation2 + $0x30] sm:$0xff]  ;;  %v47_v22 = vld [vmem:[%s403_s1 + $0x18] sm:$0xff] }
   0xe   :  { %108 = vmatpush.msra.mxu1 %v97_v9  ;;  %v90_v23 = vld [vmem:[#allocation2 + $0x28] sm:$0xff]  ;;  %v46_v24 = vld [vmem:[%s403_s1 + $0x10] sm:$0xff]  ;;  %v89_v25 = vld [vmem:[#allocation2 + $0x20] sm:$0xff] }
   0xf   :  { %68 = vmatpush.msra.mxu0 %v55_v5  ;;  %v45_v26 = vld [vmem:[%s403_s1 + $0x8] sm:$0xff]  ;;  %v88_v27 = vld [vmem:[#allocation2 + $0x18] sm:$0xff]  ;;  %v44_v28 = vld [vmem:[%s403_s1] sm:$0xff] }
  0x10   :  { %109 = vmatpush.msra.mxu1 %v96_v11  ;;  %v43_v29 = vld [vmem:[%s402_s0] sm:$0xff]  ;;  %v87_v30 = vld [vmem:[#allocation2 + $0x10] sm:$0xff]  ;;  %v86_v31 = vld [vmem:[#allocation2 + $0x8] sm:$0xff] }
  0x11   :  { %69 = vmatpush.msra.mxu0 %v54_v8  ;;  %v85_v32 = vld [vmem:[#allocation2] sm:$0xff]  ;;  %v141_v33 = vld [vmem:[%s407_s5 + $0x78] sm:$0xff]  ;;  %v140_v34 = vld [vmem:[%s407_s5 + $0x70] sm:$0xff] }
  0x12   :  { %110 = vmatpush.msra.mxu1 %v95_v13  ;;  %146 = vmatpush.msra.mxu2 %v141_v33  ;;  %v139_v35 = vld [vmem:[%s407_s5 + $0x68] sm:$0xff]  ;;  %v138_v36 = vld [vmem:[%s407_s5 + $0x60] sm:$0xff]  ;;  %v137_v37 = vld [vmem:[%s407_s5 + $0x58] sm:$0xff] }
  0x13   :  { %70 = vmatpush.msra.mxu0 %v53_v10  ;;  %v136_v38 = vld [vmem:[%s407_s5 + $0x50] sm:$0xff]  ;;  %v135_v39 = vld [vmem:[%s407_s5 + $0x48] sm:$0xff]  ;;  %v134_v40 = vld [vmem:[%s407_s5 + $0x40] sm:$0xff] }
  0x14   :  { %111 = vmatpush.msra.mxu1 %v94_v15  ;;  %147 = vmatpush.msra.mxu2 %v140_v34  ;;  %v133_v41 = vld [vmem:[%s407_s5 + $0x38] sm:$0xff]  ;;  %v132_v42 = vld [vmem:[%s407_s5 + $0x30] sm:$0xff]  ;;  %v131_v43 = vld [vmem:[%s407_s5 + $0x28] sm:$0xff] }
  0x15   :  { %71 = vmatpush.msra.mxu0 %v52_v12  ;;  %v130_v44 = vld [vmem:[%s407_s5 + $0x20] sm:$0xff]  ;;  %v129_v45 = vld [vmem:[%s407_s5 + $0x18] sm:$0xff]  ;;  %v128_v50 = vld [vmem:[%s407_s5 + $0x10] sm:$0xff] }
  0x16   :  { %112 = vmatpush.msra.mxu1 %v93_v17  ;;  %148 = vmatpush.msra.mxu2 %v139_v35  ;;  %v189_v46 = vld [vmem:[%s404_s2] ss:$0 sm:$0xff]  ;;  %v127_v51 = vld [vmem:[%s407_s5 + $0x8] sm:$0xff] }
  0x17   :  { %72 = vmatpush.msra.mxu0 %v51_v14  ;;  %v126_v52 = vld [vmem:[%s407_s5] sm:$0xff] }
  0x18   :  { %113 = vmatpush.msra.mxu1 %v92_v19  ;;  %149 = vmatpush.msra.mxu2 %v138_v36  ;;  %v190_v53 = vld [vmem:[%s406_s4] ss:$0 sm:$0xff] }
  0x19   :  { %73 = vmatpush.msra.mxu0 %v50_v16  ;;  %v191_v57 = vld [vmem:[%s408_s6] ss:$0 sm:$0xff] }
  0x1a   :  { %114 = vmatpush.msra.mxu1 %v91_v21  ;;  %150 = vmatpush.msra.mxu2 %v137_v37 }
  0x1b   :  { %74 = vmatpush.msra.mxu0 %v49_v18 }
  0x1c   :  { %115 = vmatpush.msra.mxu1 %v90_v23  ;;  %151 = vmatpush.msra.mxu2 %v136_v38 }
  0x1d   :  { %75 = vmatpush.msra.mxu0 %v48_v20 }
  0x1e   :  { %116 = vmatpush.msra.mxu1 %v89_v25  ;;  %152 = vmatpush.msra.mxu2 %v135_v39 }
  0x1f   :  { %76 = vmatpush.msra.mxu0 %v47_v22 }
  0x20   :  { %117 = vmatpush.msra.mxu1 %v88_v27  ;;  %153 = vmatpush.msra.mxu2 %v134_v40 }
  0x21   :  { %77 = vmatpush.msra.mxu0 %v46_v24 }
  0x22   :  { %118 = vmatpush.msra.mxu1 %v87_v30  ;;  %154 = vmatpush.msra.mxu2 %v133_v41 }
  0x23   :  { %78 = vmatpush.msra.mxu0 %v45_v26 }
  0x24   :  { %119 = vmatpush.msra.mxu1 %v86_v31  ;;  %155 = vmatpush.msra.mxu2 %v132_v42 }
  0x25   :  { %79 = vmatpush.msra.mxu0 %v44_v28 }
  0x26   :  { %80 = vmatmul.f32.vlgmr.msra.gmra.mxu0 %v43_v29  ;;  %120 = vmatpush.msra.mxu1 %v85_v32 }
  0x27   :  { %156 = vmatpush.msra.mxu2 %v131_v43 }
  0x29   :  { %157 = vmatpush.msra.mxu2 %v130_v44 }
  0x2b   :  { %158 = vmatpush.msra.mxu2 %v129_v45 }
  0x2d   :  { %159 = vmatpush.msra.mxu2 %v128_v50 }
  0x2f   :  { %160 = vmatpush.msra.mxu2 %v127_v51 }
  0x31   :  { %161 = vmatpush.msra.mxu2 %v126_v52 }
  0xa3   :  { %v81_v47 = vpop.f32.mrf.mxu0 }
  0xa4   :  { %v82_v48 = vadd.f32 %v189_v46, %v81_v47 }
  0xa6   :  { %v84_v49 = vmax.f32 %v82_v48, 0.0 }
  0xa8   :  { %121 = vmatmul.f32.vlgmr.msra.gmra.mxu1 %v84_v49 }
 0x125   :  { %v122_v54 = vpop.f32.mrf.mxu1 }
 0x126   :  { %v123_v55 = vadd.f32 %v190_v53, %v122_v54 }
 0x128   :  { %v125_v56 = vmax.f32 %v123_v55, 0.0 }
 0x12a   :  { %162 = vmatmul.f32.vlgmr.msra.gmra.mxu2 %v125_v56 }
 0x1ad   :  { %v163_v58 = vpop.f32.mrf.mxu2 }
 0x1ae   :  { %v164_v59 = vadd.f32 %v191_v57, %v163_v58 }
 0x1b0   :  { %167 = vst.msk [vmem:[#allocation5] sm:$0xff] %vm166_vm0, %v164_v59 }
 0x1b1   :  { %178 = dma.vmem_to_hbm [thread:$0]  %s174_s27, 128, %s176_s30, [#allocation4]  }
 0x1b2   :  { %242 = dma.done.wait [#allocation4], 128  }
 0x1b3   :  { %243 = vsyncadd [#allocation4], 4294967168 }
 0x1b4   :  { %183 = vsyncpa [#allocation3], 1 }
 0x1b5   :  { %184 = vsyncpa [#allocation4], 1 }

</bundles_post_ra>
